<compile_context>
chip_gen: v5e
topology: v5e:2x2
jax: 0.10.0
libtpu: 0.0.40
codegen_flags: <defaults>
</compile_context>

<pallas_src>
import numpy as np
import jax
import jax.numpy as jnp
from jax import lax
from jax.experimental import pallas as pl
from jax.experimental.pallas import tpu as pltpu

LANE = 128
SUBLANE = 8


def _round_up(x, m):
    return ((x + m - 1) // m) * m


def make_mring_phase_nuisance_param2img(npix,
                                        n_order=1,
                                        n_gaussian=1,
                                        fov=160.0,
                                        r_range=(10.0, 40.0),
                                        width_range=(1.0, 40.0),
                                        flux_range=(0.8, 1.2),
                                        flux_flag=False,
                                        eps=1e-4,
                                        batch_tile=8):
    """Builds a forward(params) callable matching the PyTorch module semantics."""
    nparams = (3 if flux_flag else 2) + 2 * n_order + 6 * n_gaussian
    half_fov = 0.5 * fov

    # --- host-side precompute of the image-plane grids (matches torch __init__, f32) ---
    gap = 1.0 / npix
    xs = (-1.0 + gap + 2.0 * gap * np.arange(npix)).astype(np.float32)      # torch.arange(-1+gap, 1, 2*gap)
    gx2 = np.broadcast_to(xs[None, :], (npix, npix)).astype(np.float32)     # grid_x (meshgrid 'ij')
    gy2 = np.broadcast_to(-xs[:, None], (npix, npix)).astype(np.float32)    # grid_y
    gr2 = np.sqrt(gx2 * gx2 + gy2 * gy2).astype(np.float32)
    gth2 = np.arctan2(gy2, gx2).astype(np.float32)
    cth2 = np.cos(gth2).astype(np.float32)
    sth2 = np.sin(gth2).astype(np.float32)

    # Lane-dense flattening: npix*npix pixels -> pad to multiple of 8*128 -> (rows, 128)
    n_pix = npix * npix
    n_pad = _round_up(n_pix, SUBLANE * LANE)
    rows = n_pad // LANE

    # Padded pixels sit at "radius/offset" 1e3 so every exp argument there is hugely negative and
    # the padded pixel value underflows to exactly 0.0 -> a plain jnp.sum(img) is the correct
    # normalization sum (no mask input, no mask multiply).  1e3 is moderate enough that all
    # intermediates (covinv * 1e6) stay finite: no inf*0 -> NaN.
    PAD_FAR = 1.0e3

    def _flat(a, pad_value):
        f = np.full((n_pad,), pad_value, dtype=np.float32)
        f[:n_pix] = a.reshape(-1)
        return f.reshape(rows, LANE)

    # Pack the 5 constant grids into one operand: [grid_r, grid_x, grid_y, cos(theta), sin(theta)]
    grids_np = np.stack([_flat(gr2, PAD_FAR), _flat(gx2, PAD_FAR), _flat(gy2, PAD_FAR),
                         _flat(cth2, 0.0), _flat(sth2, 0.0)], axis=0)
    grids = jnp.asarray(grids_np)
    GRIDS_BYTES = int(grids_np.nbytes)

    # Per-batch derived-scalar layout (all scalar math hoisted off the vector path):
    #   [r, -0.5/sigma^2,  (s*cos(eta), s*sin(eta)) x n_order,
    #    (x_shift, y_shift, scale, -0.5*covinv1, -0.5*covinv2, covinv12) x n_gaussian, flux]
    nd = 3 + 2 * n_order + 6 * n_gaussian

    # Row-chunk size (8..32 sublanes): bounds the live-vreg working set per inner iteration.
    CH = 16 if rows % 16 == 0 else 8
    n_chunks = rows // CH
    bytes_per_image = rows * LANE * 4

    def make_kernel(tb):
        def kernel(d_ref, grids_ref, out_ref, sum_ref):
            b = pl.program_id(0)

            # Hoist all per-image scalar reads (SMEM) out of the pixel loops.
            ring_p, mring_p, gauss_p, flux_p = [], [], [], []
            for t in range(tb):
                base = (b * tb + t) * nd
                ring_p.append((d_ref[base + 0], d_ref[base + 1]))
                mring_p.append([(d_ref[base + 2 + 2 * k], d_ref[base + 3 + 2 * k])
                                for k in range(n_order)])
                goff = base + 2 + 2 * n_order
                gauss_p.append([tuple(d_ref[goff + 6 * k + j] for j in range(6))
                                for k in range(n_gaussian)])
                flux_p.append(d_ref[base + nd - 1])
                sum_ref[t] = jnp.float32(0.0)

            # Pass 1: per row-chunk, build the unnormalized image for each of the tb batch
            # elements (re-using the same grid chunk), write it into the VMEM-resident output
            # block, and accumulate the per-image totals in SMEM scratch.
            def pass1(c, carry):
                off = pl.multiple_of(c * CH, CH)
                gr = grids_ref[0, pl.ds(off, CH), :]
                gx = grids_ref[1, pl.ds(off, CH), :]
                gy = grids_ref[2, pl.ds(off, CH), :]
                c1 = grids_ref[3, pl.ds(off, CH), :]
                s1 = grids_ref[4, pl.ds(off, CH), :]
                for t in range(tb):
                    r, q = ring_p[t]                     # q = -0.5 / sigma^2
                    dr = gr - r
                    img = jnp.exp(dr * dr * q)           # ring term (EUP)
                    if n_order > 0:
                        acc = None
                        ck, sk = c1, s1
                        for k in range(n_order):
                            if k > 0:
                                # angle-addition recurrence -> no per-pixel trig on the EUP
                                ck, sk = ck * c1 - sk * s1, sk * c1 + ck * s1
                            sc, ss = mring_p[t][k]       # s*cos(eta), s*sin(eta)
                            term = sc * ck + ss * sk
                            acc = term if acc is None else acc + term
                        img = img + acc * img            # == (1 + S') * ring, no ones() materialize
                    for k in range(n_gaussian):
                        xsf, ysf, scl, A, Bc, Cc = gauss_p[t][k]  # A=-0.5ci1, Bc=-0.5ci2, Cc=+ci12
                        xc = gx - xsf
                        yc = gy - ysf
                        arg = xc * (A * xc + Cc * yc) + Bc * (yc * yc)
                        img = img + scl * jnp.exp(arg)
                    out_ref[t, pl.ds(off, CH), :] = img
                    sum_ref[t] = sum_ref[t] + jnp.sum(img)
                return carry

            lax.fori_loop(0, n_chunks, pass1, 0)

            # One exact scalar divide per image (approx reciprocal would hurt tolerance).
            scales = [flux_p[t] / sum_ref[t] for t in range(tb)]

            # Pass 2: normalize in place (stays inside VMEM; one vld + vmul + vst per pixel).
            def pass2(c, carry):
                off = pl.multiple_of(c * CH, CH)
                for t in range(tb):
                    out_ref[t, pl.ds(off, CH), :] = out_ref[t, pl.ds(off, CH), :] * scales[t]
                return carry

            lax.fori_loop(0, n_chunks, pass2, 0)

        return kernel

    VMEM_BUDGET = 44 * (1 << 20)   # conservative so the block plan also fits v7x (64 MiB physical)

    def _pick_tb(B):
        # tb is a divisor of B: no padded-batch slots -> no discarded compute, no 0/0 risk.
        divs = [d for d in range(1, min(B, batch_tile) + 1) if B % d == 0]
        cands = [d for d in divs if B // d >= 2] or divs   # keep >= 2 grid steps (v7x megacore)
        tb = max(cands)
        while tb > 1 and (2 * tb * bytes_per_image + 2 * GRIDS_BYTES) > VMEM_BUDGET:
            smaller = [d for d in divs if d < tb]
            tb = max(smaller) if smaller else 1
        return tb

    def forward(params):
        p = jnp.asarray(params, dtype=jnp.float32)
        B = p.shape[0]
        assert p.shape == (B, nparams)

        # ---- hoist all per-batch scalar math (tiny XLA ops, off the kernel vector path) ----
        r = r_range[0] / half_fov + p[:, 0] * (r_range[1] - r_range[0]) / half_fov
        sigma = width_range[0] / half_fov + p[:, 1] * (width_range[1] - width_range[0]) / half_fov
        cols = [r, -0.5 / (sigma * sigma)]
        for k in range(n_order):
            s = p[:, 2 + 2 * k]
            eta = (181.0 / 180.0) * np.pi * (2.0 * p[:, 3 + 2 * k] - 1.0)
            cols += [s * jnp.cos(eta), s * jnp.sin(eta)]
        for k in range(n_gaussian):
            i0 = 2 + 2 * n_order + 6 * k
            x_shift = 2.0 * p[:, i0 + 0] - 1.0
            y_shift = 2.0 * p[:, i0 + 1] - 1.0
            scale = p[:, i0 + 2]
            sigma_x = p[:, i0 + 3]
            sigma_y = p[:, i0 + 4]
            rho = 2.0 * 0.99 * (p[:, i0 + 5] - 0.5)
            sigma_xy = rho * sigma_x * sigma_y
            factor = eps ** 2 + (1.0 - rho ** 2) * sigma_x ** 2 * sigma_y ** 2
            covinv1 = sigma_y ** 2 / factor
            covinv2 = sigma_x ** 2 / factor
            covinv12 = sigma_xy / factor
            # pre-negated / pre-halved -> kernel exp argument needs no extra negate/halve
            cols += [x_shift, y_shift, scale, -0.5 * covinv1, -0.5 * covinv2, covinv12]
        if flux_flag:
            flux = flux_range[0] + (flux_range[1] - flux_range[0]) * p[:, 2 + 2 * n_order + 6 * n_gaussian]
        else:
            flux = jnp.ones((B,), dtype=jnp.float32)
        cols.append(flux)
        derived = jnp.stack(cols, axis=1).astype(jnp.float32)     # (B, nd)
        derived_flat = derived.reshape(-1)

        tb = _pick_tb(B)
        est_bytes = 2 * tb * bytes_per_image + 2 * GRIDS_BYTES + (2 << 20)
        vmem_limit = int(min(max(est_bytes, 32 << 20), 60 << 20))

        grid_spec = pltpu.PrefetchScalarGridSpec(
            num_scalar_prefetch=1,
            grid=(B // tb,),
            # one packed constant-grid operand; constant index_map -> fetched once
            in_specs=[pl.BlockSpec((5, rows, LANE), lambda b, d: (0, 0, 0))],
            out_specs=pl.BlockSpec((tb, rows, LANE), lambda b, d: (b, 0, 0)),
            scratch_shapes=[pltpu.SMEM((tb,), jnp.float32)],
        )
        out = pl.pallas_call(
            make_kernel(tb),
            out_shape=jax.ShapeDtypeStruct((B, rows, LANE), jnp.float32),
            grid_spec=grid_spec,
            compiler_params=pltpu.CompilerParams(
                dimension_semantics=("parallel",),      # batch images are independent (v7x 2 TCs)
                vmem_limit_bytes=vmem_limit),
        )(derived_flat, grids)

        # un-flatten / un-pad back to (B, npix, npix)
        out = out.reshape(B, n_pad)[:, :n_pix].reshape(B, npix, npix)
        return out

    return forward, nparams


def reference_forward(params, npix, n_order=1, n_gaussian=1, fov=160.0,
                      r_range=(10.0, 40.0), width_range=(1.0, 40.0),
                      flux_range=(0.8, 1.2), flux_flag=False, eps=1e-4):
    """Plain-JAX replica of the PyTorch forward (for correctness checking)."""
    gap = 1.0 / npix
    xs = (-1.0 + gap + 2.0 * gap * np.arange(npix)).astype(np.float32)
    grid_x = jnp.asarray(np.broadcast_to(xs[None, :], (npix, npix)).astype(np.float32))
    grid_y = jnp.asarray(np.broadcast_to(-xs[:, None], (npix, npix)).astype(np.float32))
    grid_r = jnp.sqrt(grid_x ** 2 + grid_y ** 2)
    grid_theta = jnp.arctan2(grid_y, grid_x)

    p = jnp.asarray(params, dtype=jnp.float32)
    r = r_range[0] / (0.5 * fov) + p[:, 0][:, None, None] * (r_range[1] - r_range[0]) / (0.5 * fov)
    sigma = width_range[0] / (0.5 * fov) + p[:, 1][:, None, None] * (width_range[1] - width_range[0]) / (0.5 * fov)
    ring = jnp.exp(-0.5 * (grid_r - r) ** 2 / sigma ** 2)

    S = jnp.ones_like(ring)
    for k in range(n_order):
        s = p[:, 2 + 2 * k][:, None, None]
        eta = 181.0 / 180.0 * np.pi * (2.0 * p[:, 3 + 2 * k][:, None, None] - 1.0)
        S = S + s * jnp.cos((k + 1) * grid_theta - eta)
    crescent = S * ring if n_order > 0 else ring

    for k in range(n_gaussian):
        i0 = 2 + 2 * n_order + 6 * k
        x_shift = (2.0 * p[:, i0 + 0] - 1.0)[:, None, None]
        y_shift = (2.0 * p[:, i0 + 1] - 1.0)[:, None, None]
        scale = p[:, i0 + 2][:, None, None]
        sigma_x = p[:, i0 + 3][:, None, None]
        sigma_y = p[:, i0 + 4][:, None, None]
        rho = 2.0 * 0.99 * (p[:, i0 + 5][:, None, None] - 0.5)
        sigma_xy = rho * sigma_x * sigma_y
        factor = eps ** 2 + (1.0 - rho ** 2) * sigma_x ** 2 * sigma_y ** 2
        covinv1 = sigma_y ** 2 / factor
        covinv2 = sigma_x ** 2 / factor
        covinv12 = sigma_xy / factor
        x_c = grid_x - x_shift
        y_c = grid_y - y_shift
        delta = 0.5 * (covinv1 * x_c ** 2 + covinv2 * y_c ** 2 - 2.0 * covinv12 * x_c * y_c)
        crescent = crescent + jnp.exp(-delta) * scale

    denom = jnp.sum(crescent, axis=(-1, -2))[:, None, None]
    if flux_flag:
        flux = flux_range[0] + (flux_range[1] - flux_range[0]) * p[:, 2 + 2 * n_order + 6 * n_gaussian][:, None, None]
        return flux * crescent / denom
    return crescent / denom


if __name__ == "__main__":
    npix = 16
    n_order = 1
    n_gaussian = 1

    forward, nparams = make_mring_phase_nuisance_param2img(
        npix, n_order=n_order, n_gaussian=n_gaussian, flux_flag=False, batch_tile=8)

    key = jax.random.PRNGKey(0)

    # batch=2 -> tb=1, grid=(2,)
    params2 = jax.random.uniform(key, (2, nparams), dtype=jnp.float32)   # params assumed in [0, 1]
    out2 = jax.block_until_ready(forward(params2))
    assert out2.shape == (2, npix, npix)
    assert out2.dtype == jnp.float32
    assert np.isfinite(np.asarray(out2)).all()
    ref2 = jax.block_until_ready(
        reference_forward(params2, npix, n_order=n_order, n_gaussian=n_gaussian, flux_flag=False))
    np.testing.assert_allclose(np.asarray(out2), np.asarray(ref2), rtol=2e-5, atol=2e-6)

    # batch=4 -> tb=2, grid=(2,)  (exercises the unrolled multi-image path per grid step)
    params4 = jax.random.uniform(jax.random.PRNGKey(1), (4, nparams), dtype=jnp.float32)
    out4 = jax.block_until_ready(forward(params4))
    ref4 = jax.block_until_ready(
        reference_forward(params4, npix, n_order=n_order, n_gaussian=n_gaussian, flux_flag=False))
    np.testing.assert_allclose(np.asarray(out4), np.asarray(ref4), rtol=2e-5, atol=2e-6)

    print("KERNEL_OK")
</pallas_src>

<mosaic_0001>
module attributes {stable_mosaic.version = 11 : i64} {
  func.func @kernel(%arg0: i32, %arg1: memref<22xf32, #tpu.memory_space<smem>>, %arg2: memref<5x8x128xf32, #tpu.memory_space<vmem>>, %arg3: memref<1x8x128xf32, #tpu.memory_space<vmem>>, %arg4: memref<1xf32, #tpu.memory_space<smem>>) attributes {dimension_semantics = [#tpu.dimension_semantics<parallel>], iteration_bounds = array<i64: 2>, scalar_prefetch = 1 : i64, scratch_operands = 1 : i64, tpu.core_type = #tpu.core_type<tc>, window_params = [{pipeline_mode = #tpu.pipeline_mode<synchronous>, transform_indices = @transform_0, window_bounds = array<i64: 5, 8, 128>}, {transform_indices = @transform_1, window_bounds = array<i64: 1, 8, 128>}]} {
    %c1_i32 = arith.constant 1 : i32
    %0 = arith.muli %arg0, %c1_i32 : i32
    %c0_i32 = arith.constant 0 : i32
    %1 = arith.addi %0, %c0_i32 : i32
    %c11_i32 = arith.constant 11 : i32
    %2 = arith.muli %1, %c11_i32 : i32
    %c0_i32_0 = arith.constant 0 : i32
    %3 = arith.addi %2, %c0_i32_0 : i32
    %4 = arith.index_cast %3 : i32 to index
    %5 = memref.load %arg1[%4] : memref<22xf32, #tpu.memory_space<smem>>
    %c1_i32_1 = arith.constant 1 : i32
    %6 = arith.addi %2, %c1_i32_1 : i32
    %7 = arith.index_cast %6 : i32 to index
    %8 = memref.load %arg1[%7] : memref<22xf32, #tpu.memory_space<smem>>
    %c2_i32 = arith.constant 2 : i32
    %9 = arith.addi %2, %c2_i32 : i32
    %c0_i32_2 = arith.constant 0 : i32
    %10 = arith.addi %9, %c0_i32_2 : i32
    %11 = arith.index_cast %10 : i32 to index
    %12 = memref.load %arg1[%11] : memref<22xf32, #tpu.memory_space<smem>>
    %c3_i32 = arith.constant 3 : i32
    %13 = arith.addi %2, %c3_i32 : i32
    %c0_i32_3 = arith.constant 0 : i32
    %14 = arith.addi %13, %c0_i32_3 : i32
    %15 = arith.index_cast %14 : i32 to index
    %16 = memref.load %arg1[%15] : memref<22xf32, #tpu.memory_space<smem>>
    %c2_i32_4 = arith.constant 2 : i32
    %17 = arith.addi %2, %c2_i32_4 : i32
    %c2_i32_5 = arith.constant 2 : i32
    %18 = arith.addi %17, %c2_i32_5 : i32
    %c0_i32_6 = arith.constant 0 : i32
    %19 = arith.addi %18, %c0_i32_6 : i32
    %c0_i32_7 = arith.constant 0 : i32
    %20 = arith.addi %19, %c0_i32_7 : i32
    %21 = arith.index_cast %20 : i32 to index
    %22 = memref.load %arg1[%21] : memref<22xf32, #tpu.memory_space<smem>>
    %c0_i32_8 = arith.constant 0 : i32
    %23 = arith.addi %18, %c0_i32_8 : i32
    %c1_i32_9 = arith.constant 1 : i32
    %24 = arith.addi %23, %c1_i32_9 : i32
    %25 = arith.index_cast %24 : i32 to index
    %26 = memref.load %arg1[%25] : memref<22xf32, #tpu.memory_space<smem>>
    %c0_i32_10 = arith.constant 0 : i32
    %27 = arith.addi %18, %c0_i32_10 : i32
    %c2_i32_11 = arith.constant 2 : i32
    %28 = arith.addi %27, %c2_i32_11 : i32
    %29 = arith.index_cast %28 : i32 to index
    %30 = memref.load %arg1[%29] : memref<22xf32, #tpu.memory_space<smem>>
    %c0_i32_12 = arith.constant 0 : i32
    %31 = arith.addi %18, %c0_i32_12 : i32
    %c3_i32_13 = arith.constant 3 : i32
    %32 = arith.addi %31, %c3_i32_13 : i32
    %33 = arith.index_cast %32 : i32 to index
    %34 = memref.load %arg1[%33] : memref<22xf32, #tpu.memory_space<smem>>
    %c0_i32_14 = arith.constant 0 : i32
    %35 = arith.addi %18, %c0_i32_14 : i32
    %c4_i32 = arith.constant 4 : i32
    %36 = arith.addi %35, %c4_i32 : i32
    %37 = arith.index_cast %36 : i32 to index
    %38 = memref.load %arg1[%37] : memref<22xf32, #tpu.memory_space<smem>>
    %c0_i32_15 = arith.constant 0 : i32
    %39 = arith.addi %18, %c0_i32_15 : i32
    %c5_i32 = arith.constant 5 : i32
    %40 = arith.addi %39, %c5_i32 : i32
    %41 = arith.index_cast %40 : i32 to index
    %42 = memref.load %arg1[%41] : memref<22xf32, #tpu.memory_space<smem>>
    %c11_i32_16 = arith.constant 11 : i32
    %43 = arith.addi %2, %c11_i32_16 : i32
    %c1_i32_17 = arith.constant 1 : i32
    %44 = arith.subi %43, %c1_i32_17 : i32
    %45 = arith.index_cast %44 : i32 to index
    %46 = memref.load %arg1[%45] : memref<22xf32, #tpu.memory_space<smem>>
    %cst = arith.constant 0.000000e+00 : f32
    %c0 = arith.constant 0 : index
    %47 = memref.load %arg4[%c0] : memref<1xf32, #tpu.memory_space<smem>>
    memref.store %cst, %arg4[%c0] : memref<1xf32, #tpu.memory_space<smem>>
    %c0_i32_18 = arith.constant 0 : i32
    %c8_i32 = arith.constant 8 : i32
    %48 = arith.muli %c0_i32_18, %c8_i32 : i32
    %49 = tpu.assume_multiple %48, 8 : i32
    %c0_19 = arith.constant 0 : index
    %50 = arith.index_cast %49 : i32 to index
    %c0_20 = arith.constant 0 : index
    %51 = vector.load %arg2[%c0_19, %50, %c0_20] : memref<5x8x128xf32, #tpu.memory_space<vmem>>, vector<1x8x128xf32>
    %52 = vector.shape_cast %51 : vector<1x8x128xf32> to vector<8x128xf32>
    %c1 = arith.constant 1 : index
    %53 = arith.index_cast %49 : i32 to index
    %c0_21 = arith.constant 0 : index
    %54 = vector.load %arg2[%c1, %53, %c0_21] : memref<5x8x128xf32, #tpu.memory_space<vmem>>, vector<1x8x128xf32>
    %55 = vector.shape_cast %54 : vector<1x8x128xf32> to vector<8x128xf32>
    %c2 = arith.constant 2 : index
    %56 = arith.index_cast %49 : i32 to index
    %c0_22 = arith.constant 0 : index
    %57 = vector.load %arg2[%c2, %56, %c0_22] : memref<5x8x128xf32, #tpu.memory_space<vmem>>, vector<1x8x128xf32>
    %58 = vector.shape_cast %57 : vector<1x8x128xf32> to vector<8x128xf32>
    %c3 = arith.constant 3 : index
    %59 = arith.index_cast %49 : i32 to index
    %c0_23 = arith.constant 0 : index
    %60 = vector.load %arg2[%c3, %59, %c0_23] : memref<5x8x128xf32, #tpu.memory_space<vmem>>, vector<1x8x128xf32>
    %61 = vector.shape_cast %60 : vector<1x8x128xf32> to vector<8x128xf32>
    %c4 = arith.constant 4 : index
    %62 = arith.index_cast %49 : i32 to index
    %c0_24 = arith.constant 0 : index
    %63 = vector.load %arg2[%c4, %62, %c0_24] : memref<5x8x128xf32, #tpu.memory_space<vmem>>, vector<1x8x128xf32>
    %64 = vector.shape_cast %63 : vector<1x8x128xf32> to vector<8x128xf32>
    %65 = vector.broadcast %5 : f32 to vector<8x128xf32>
    %66 = arith.subf %52, %65 : vector<8x128xf32>
    %67 = arith.mulf %66, %66 : vector<8x128xf32>
    %68 = vector.broadcast %8 : f32 to vector<8x128xf32>
    %69 = arith.mulf %67, %68 : vector<8x128xf32>
    %70 = math.exp %69 : vector<8x128xf32>
    %71 = vector.broadcast %12 : f32 to vector<8x128xf32>
    %72 = arith.mulf %71, %61 : vector<8x128xf32>
    %73 = vector.broadcast %16 : f32 to vector<8x128xf32>
    %74 = arith.mulf %73, %64 : vector<8x128xf32>
    %75 = arith.addf %72, %74 : vector<8x128xf32>
    %76 = arith.mulf %75, %70 : vector<8x128xf32>
    %77 = arith.addf %70, %76 : vector<8x128xf32>
    %78 = vector.broadcast %22 : f32 to vector<8x128xf32>
    %79 = arith.subf %55, %78 : vector<8x128xf32>
    %80 = vector.broadcast %26 : f32 to vector<8x128xf32>
    %81 = arith.subf %58, %80 : vector<8x128xf32>
    %82 = vector.broadcast %34 : f32 to vector<8x128xf32>
    %83 = arith.mulf %82, %79 : vector<8x128xf32>
    %84 = vector.broadcast %42 : f32 to vector<8x128xf32>
    %85 = arith.mulf %84, %81 : vector<8x128xf32>
    %86 = arith.addf %83, %85 : vector<8x128xf32>
    %87 = arith.mulf %79, %86 : vector<8x128xf32>
    %88 = arith.mulf %81, %81 : vector<8x128xf32>
    %89 = vector.broadcast %38 : f32 to vector<8x128xf32>
    %90 = arith.mulf %89, %88 : vector<8x128xf32>
    %91 = arith.addf %87, %90 : vector<8x128xf32>
    %92 = math.exp %91 : vector<8x128xf32>
    %93 = vector.broadcast %30 : f32 to vector<8x128xf32>
    %94 = arith.mulf %93, %92 : vector<8x128xf32>
    %95 = arith.addf %77, %94 : vector<8x128xf32>
    %c0_25 = arith.constant 0 : index
    %96 = arith.index_cast %49 : i32 to index
    %c0_26 = arith.constant 0 : index
    %97 = vector.load %arg3[%c0_25, %96, %c0_26] : memref<1x8x128xf32, #tpu.memory_space<vmem>>, vector<1x8x128xf32>
    %98 = vector.shape_cast %97 : vector<1x8x128xf32> to vector<8x128xf32>
    %99 = vector.shape_cast %95 : vector<8x128xf32> to vector<1x8x128xf32>
    tpu.vector_store %arg3[%c0_25, %96, %c0_26], %99 {strides = array<i32>} : memref<1x8x128xf32, #tpu.memory_space<vmem>>, vector<1x8x128xf32>,
    %c0_27 = arith.constant 0 : index
    %100 = memref.load %arg4[%c0_27] : memref<1xf32, #tpu.memory_space<smem>>
    %101 = vector.shape_cast %95 : vector<8x128xf32> to vector<1x8x128xf32>
    %cst_28 = arith.constant dense<0.000000e+00> : vector<1xf32>
    %102 = vector.multi_reduction <add>, %101, %cst_28 [1, 2] : vector<1x8x128xf32> to vector<1xf32>
    %103 = vector.shape_cast %102 : vector<1xf32> to vector<1x1x1xf32>
    %104 = vector.extract %103[0, 0, 0] : f32 from vector<1x1x1xf32>
    %105 = arith.addf %100, %104 : f32
    %c0_29 = arith.constant 0 : index
    %106 = memref.load %arg4[%c0_29] : memref<1xf32, #tpu.memory_space<smem>>
    memref.store %105, %arg4[%c0_29] : memref<1xf32, #tpu.memory_space<smem>>
    %c1_i32_30 = arith.constant 1 : i32
    %c0_31 = arith.constant 0 : index
    %107 = memref.load %arg4[%c0_31] : memref<1xf32, #tpu.memory_space<smem>>
    %108 = arith.divf %46, %107 : f32
    %c0_i32_32 = arith.constant 0 : i32
    %c8_i32_33 = arith.constant 8 : i32
    %109 = arith.muli %c0_i32_32, %c8_i32_33 : i32
    %110 = tpu.assume_multiple %109, 8 : i32
    %c0_34 = arith.constant 0 : index
    %111 = arith.index_cast %110 : i32 to index
    %c0_35 = arith.constant 0 : index
    %112 = vector.load %arg3[%c0_34, %111, %c0_35] : memref<1x8x128xf32, #tpu.memory_space<vmem>>, vector<1x8x128xf32>
    %113 = vector.shape_cast %112 : vector<1x8x128xf32> to vector<8x128xf32>
    %114 = vector.broadcast %108 : f32 to vector<8x128xf32>
    %115 = arith.mulf %113, %114 : vector<8x128xf32>
    %c0_36 = arith.constant 0 : index
    %116 = arith.index_cast %110 : i32 to index
    %c0_37 = arith.constant 0 : index
    %117 = vector.load %arg3[%c0_36, %116, %c0_37] : memref<1x8x128xf32, #tpu.memory_space<vmem>>, vector<1x8x128xf32>
    %118 = vector.shape_cast %117 : vector<1x8x128xf32> to vector<8x128xf32>
    %119 = vector.shape_cast %115 : vector<8x128xf32> to vector<1x8x128xf32>
    tpu.vector_store %arg3[%c0_36, %116, %c0_37], %119 {strides = array<i32>} : memref<1x8x128xf32, #tpu.memory_space<vmem>>, vector<1x8x128xf32>,
    %c1_i32_38 = arith.constant 1 : i32
    return
  }
  func.func @transform_0(%arg0: i32, %arg1: memref<22xf32, #tpu.memory_space<smem>>) -> (i32, i32, i32) {
    %c0_i32 = arith.constant 0 : i32
    %c0_i32_0 = arith.constant 0 : i32
    %c0_i32_1 = arith.constant 0 : i32
    %c0_i32_2 = arith.constant 0 : i32
    return %c0_i32, %c0_i32_0, %c0_i32_1 : i32, i32, i32
  }
  func.func @transform_1(%arg0: i32, %arg1: memref<22xf32, #tpu.memory_space<smem>>) -> (i32, i32, i32) {
    %c0_i32 = arith.constant 0 : i32
    %c0_i32_0 = arith.constant 0 : i32
    %c0_i32_1 = arith.constant 0 : i32
    return %arg0, %c0_i32, %c0_i32_0 : i32, i32, i32
  }
}

</mosaic_0001>

<bundles_post_ra>
// kernel: tpu_custom_call.1
= control target key start
LH: loop header
LB: loop body
LE: loop exit
PB: predicated region body
PF: predicated region fallthrough
CT: control target
= control target key end

     0   :  { %s490_s12 = smov [#allocation4]   ;;  %s622_s0 = inlined_call_operand.hbm [shape: f32[22], index: 0, kind: input, shape index: {}]   ;;  %s623_s1 = inlined_call_operand.hbm [shape: f32[5,8,128], index: 1, kind: input, shape index: {}]   ;;  %s624_s2 = inlined_call_operand.hbm [shape: f32[2,8,128], index: 2, kind: output, shape index: {}]  }
   0x1   :  { %s8_s11 = sshll.u32 %s622_s0, 4  ;;  %s9_s11 = int_to_ptr.hbm [resolvable:$true] %s8_s11 }
   0x2   :  { %11 = dma.hbm_to_smem %s9_s11, 16, %s490_s12, [#allocation3] }
   0x3   :  { %464 = dma.done.wait [#allocation3], 16 }
   0x4   :  { %465 = vsyncadd [#allocation3], 4294967280 }
   0x5   :  { %14 = sfence }
   0x6   :  { %15 = vsyncpa [#allocation6], 0 }
   0x7   :  { %16 = vsyncpa [#allocation7], 0 }
   0x8   :  { %18 = vsyncpa [#allocation7 + $0x1], 0  ;;  %s512_s13 = smov 0   ;;  %s514_s14 = smov 0  }
   0x9   :  { %s516_s15 = smov 0   ;;  %s518_s16 = smov 0  }
   0xa LB: > { %s533_s0 = sadd.s32 4294967295, %s488_s16   ;;  %s305_s17 = sadd.s32 4294967294, %s488_s16   ;;  %s488_s16 = sphi %s518_s16, %s630_s16   ;;  %s484_s15 = sphi %s516_s15, %s629_s15   ;;  %s480_s14 = sphi %s514_s14, %s628_s14   ;;  %s476_s13 = sphi %s512_s13, %s627_s13  }
   0xb   : > { %s537_s18 = sadd.s32 1, %s488_s16   ;;  %s52_s19 = sadd.s32 1, %s484_s15 }
   0xc   : > { %s49_s20 = ssub.s32 %s488_s16, %s537_s18  ;;  %p62_p0 = scmp.ne.s32.totalorder %s484_s15, %s480_s14 }
   0xd   : > { %p50_p1 = scmp.eq.s32.totalorder %s49_s20, 0  ;;  %p63_p2 = scmp.eq.s32.totalorder %s533_s0, 1 }
   0xe   : > { %p68_p3 = scmp.ne.s32.totalorder %s480_s14, %s476_s13  ;;  %p69_p4 = scmp.eq.s32.totalorder %s305_s17, 1 }
   0xf   : > { %s548_s21 = scalar_select %p50_p1, %s484_s15, %s52_s19  }
  0x10   : > { %p550_p5 = por %p63_p2, %p62_p0  ;;  %p554_p6 = por %p69_p4, %p68_p3 }
  0x11   : > { %p306_p7 = scmp.ge.s32.totalorder %s488_s16, 1  ;;  %p76_p8 = scmp.lt.s32.totalorder %s488_s16, 3 }
  0x12   : > { %p333_p9 = scmp.eq.s32.totalorder %s533_s0, 0  ;;  %s87_s26 = sshll.u32 %s623_s1, 4  ;;  %s88_s26 = int_to_ptr.hbm [resolvable:$true] %s87_s26 }
  0x13   : > { %p77_p10 = pnand %p306_p7, %p76_p8  ;;  %s491_s27 = smov [#allocation5]  }
  0x14   : > { %s89_s28 = sshll.u32 %s491_s27, 4  ;;  %s492_s29 = smov 128   ;;  %s90_s28 = int_to_ptr.vmem [resolvable:$true] %s89_s28 }
  0x15   : > { %p325_p11 = pneg %p77_p10  ;;  %s493_s30 = smov 8  }
  0x16   : > { %105 = sbr.rel (%p77_p10) target bundleno = 321 (0x141), region = 24 }
  0x17   : > { %p326_p12 = pnand %p333_p9, %p325_p11 }
  0x19   : > { %328 = dma.hbm_to_vmem [thread:$0]  (!%p326_p12), %s88_s26, 640, %s90_s28, [#allocation6], %s492_s29, %s492_s29, %s493_s30  }
  0x1b   : > { %467 = dma.done.wait (%p333_p9), [#allocation6], 640  }
  0x1c   : > { %469 = vsyncadd (%p333_p9), [#allocation6], 4294966656  ;;  %s571_s3 = smul.u32 11, %s533_s0  ;;  %v145_v0 = vld [vmem:[#allocation5] sm:$0xff]  ;;  %v148_v4 = vld [vmem:[#allocation5 + $0x8] sm:$0xff] }
  0x1d   : > { %v151_v6 = vld [vmem:[#allocation5 + $0x10] sm:$0xff]  ;;  %v154_v18 = vld [vmem:[#allocation5 + $0x18] sm:$0xff]  ;;  %v157_v19 = vld [vmem:[#allocation5 + $0x20] sm:$0xff] }
  0x1e   : > { %s122_s4 = sld [smem:[#allocation4 + %s571_s3]]  ;;  %s123_s5 = sadd.s32 1, %s571_s3 }
  0x1f   : > { %s125_s6 = sadd.s32 2, %s571_s3  ;;  %s124_s7 = sld [smem:[#allocation4 + %s123_s5]] }
  0x20   : > { %s127_s8 = sadd.s32 3, %s571_s3  ;;  %s129_s9 = sadd.s32 4, %s571_s3 }
  0x21   : > { %s578_s10 = sld [smem:[#allocation4 + %s125_s6]]  ;;  %s131_s11 = sadd.s32 5, %s571_s3 }
  0x22   : > { %s130_s12 = sld [smem:[#allocation4 + %s129_s9]]  ;;  %s135_s19 = sadd.s32 7, %s571_s3 }
  0x23   : > { %s132_s17 = sld [smem:[#allocation4 + %s131_s11]]  ;;  %s137_s24 = sadd.s32 8, %s571_s3 }
  0x24   : > { %v158_v1 = vstv %s122_s4  ;;  %s582_s20 = sld [smem:[#allocation4 + %s127_s8]]  ;;  %s139_s26 = sadd.s32 9, %s571_s3 }
  0x25   : > { %v159_v2 = vsub.f32 %v145_v0, %v158_v1  ;;  %s136_s25 = sld [smem:[#allocation4 + %s135_s19]]  ;;  %v161_v3 = vstv %s124_s7  ;;  %s133_s29 = sadd.s32 6, %s571_s3 }
  0x26   : > { %s138_s27 = sld [smem:[#allocation4 + %s137_s24]]  ;;  %s141_s5 = sadd.s32 10, %s571_s3 }
  0x27   : > { %v160_v5 = vmul.f32 %v159_v2, %v159_v2  ;;  %s140_s28 = sld [smem:[#allocation4 + %s139_s26]]  ;;  %v165_v20 = vstv %s578_s10  ;;  %s118_s6 = sand.u32 1, %s480_s14  }
  0x28   : > { %v172_v8 = vstv %s130_s12  ;;  %v166_v25 = vmul.f32 %v165_v20, %v154_v18  ;;  %s134_s30 = sld [smem:[#allocation4 + %s133_s29]]  ;;  %s310_s8 = sshll.u32 %s118_s6, 3 }
  0x29   : > { %v162_v7 = vmul.f32 %v161_v3, %v160_v5  ;;  %v173_v9 = vsub.f32 %v148_v4, %v172_v8  ;;  %v174_v10 = vstv %s132_s17  ;;  %s142_s7 = sld [smem:[#allocation4 + %s141_s5]]  ;;  %s312_s9 = sshll.u32 %s533_s0, 3 }
  0x2a   : > { %v175_v11 = vsub.f32 %v151_v6, %v174_v10  ;;  %v167_v21 = vstv %s582_s20  ;;  %s237_s12 = scalar_lea.hbm %s624_s2, %s312_s9  ;;  %s120_s19 = scalar_lea.vmem [#allocation8], %s310_s8 }
  0x2b   : > { %v176_v12 = vstv %s136_s25  ;;  %v163_v13 = vmul.f32 1.442695, %v162_v7  ;;  %v168_v26 = vmul.f32 %v167_v21, %v157_v19  ;;  %s239_s20 = sshll.u32 %s120_s19, 4  ;;  %s241_s25 = sshll.u32 %s237_s12, 4  ;;  %s240_s20 = int_to_ptr.vmem [resolvable:$true] %s239_s20  ;;  %s242_s25 = int_to_ptr.hbm [resolvable:$true] %s241_s25 }
  0x2c   : > { %v177_v14 = vmul.f32 %v176_v12, %v173_v9  ;;  %v182_v15 = vmul.f32 %v175_v11, %v175_v11  ;;  %v183_v17 = vstv %s138_s27  ;;  %s227_s3 = scalar_lea.sflag [#allocation7], %s118_s6  ;;  %s434_s26 = sshra.s32 %s242_s25, 4  ;;  %s435_s26 = int_to_ptr.hbm [resolvable:$true] %s434_s26 }
  0x2d   : > { %v178_v16 = vstv %s140_s28  ;;  %372 = vpow2.f32 %v163_v13  ;;  %v169_v29 = vadd.f32 %v168_v26, %v166_v25  ;;  %s436_s27 = scalar_lea.hbm %s435_s26, 8  ;;  %s440_s29 = scalar_lea.hbm %s624_s2, 16 }
  0x2e   : > { %v179_v22 = vmul.f32 %v178_v16, %v175_v11  ;;  %v184_v24 = vmul.f32 %v183_v17, %v182_v15  ;;  %v188_v33 = vstv %s134_s30  ;;  %p437_p13 = scmp.ne.s32.totalorder %s435_s26, %s436_s27  ;;  %p441_p2 = scmp.lt.s32.totalorder %s435_s26, %s624_s2 }
  0x2f   : > { %p442_p3 = scmp.lt.s32.totalorder %s440_s29, %s436_s27 }
  0x30   : > { %v180_v23 = vadd.f32 %v179_v22, %v177_v14  ;;  %p438_p0 = pnand %p437_p13, %p550_p5 }
  0x31   : > { %p443_p4 = por %p442_p3, %p441_p2 }
  0x32   : > { %v181_v27 = vmul.f32 %v180_v23, %v173_v9  ;;  %p439_p1 = pneg %p438_p0 }
  0x33   : > { %v373_v30 = vpop.eup %372 }
  0x34   : > { %v185_v28 = vadd.f32 %v184_v24, %v181_v27  ;;  %v170_v32 = vmul.f32 %v373_v30, %v169_v29  ;;  %p444_p7 = pnand %p443_p4, %p439_p1 }
  0x36   : > { %v186_v31 = vmul.f32 1.442695, %v185_v28  ;;  %v171_v34 = vadd.f32 %v373_v30, %v170_v32 }
  0x38   : > { %374 = vpow2.f32 %v186_v31 }
  0x3e   : > { %v375_v35 = vpop.eup %374 }
  0x3f   : > { %v189_v36 = vmul.f32 %v375_v35, %v188_v33 }
  0x41   : > { %v190_v37 = vadd.f32 %v189_v36, %v171_v34 }
  0x43   : > { %193 = vadd.xlane.f32.xlu0 %v190_v37 }
  0xb6   : > { %v194_v38 = vpop.xlane.xlu0 %193 }
  0xb7   : > { %v195_v39 = vrot.slane %v194_v38, 4 }
  0xb9   : > { %v196_v40 = vadd.f32 %v195_v39, %v194_v38 }
  0xbb   : > { %v197_v41 = vrot.slane %v196_v40, 2 }
  0xbd   : > { %v198_v42 = vadd.f32 %v197_v41, %v196_v40 }
  0xbf   : > { %v199_v43 = vrot.slane %v198_v42, 1 }
  0xc1   : > { %v200_v44 = vadd.f32 %v199_v43, %v198_v42 }
  0xc3   : > { %315 = vpush %v200_v44 }
  0xf4   : > { %s316_s4 = spop %315 }
  0xf5   : > { %v205_v45 = vstv %s316_s4 }
  0xf6   : > { %376 = vrcp.f32 %v205_v45  ;;  %v217_v49 = vand.u32 2147483648, %v205_v45  ;;  %v215_v51 = vand.u32 2147483647, %v205_v45  ;;  %vm211_vm1 = vweird.f32 %v205_v45 }
  0xf8   : > { %v218_v53 = vor.u32 1.1754944e-38, %v217_v49  ;;  %vm216_vm3 = vcmp.eq.f32.partialorder %v215_v51, 8.507059e+37 }
  0xfc   : > { %v377_v46 = vpop.eup %376 }
  0xfd   : > { %v207_v47 = vmul.f32 %v377_v46, %v205_v45  ;;  %vm212_vm0 = vweird.f32 %v377_v46 }
  0xfe   : > { %vm213_vm2 = vmor %vm211_vm1, %vm212_vm0 }
  0xff   : > { %v208_v48 = vsub.f32 1.0, %v207_v47 }
 0x101   : > { %v209_v50 = vmul.f32 %v377_v46, %v208_v48 }
 0x103   : > { %v210_v52 = vadd.f32 %v377_v46, %v209_v50 }
 0x105   : > { %v214_v54 = vsel %vm213_vm2, %v377_v46, %v210_v52 }
 0x106   : > { %v219_v55 = vsel %vm216_vm3, %v218_v53, %v214_v54 }
 0x107   : > { %317 = vpush %v219_v55 }
 0x138   : > { %s318_s17 = spop %317 }
 0x139   : > { %s221_s24 = smul.f32 %s318_s17, %s142_s7 }
 0x13b   : > { %v223_v56 = vstv %s221_s24 }
 0x13c   : > { %v224_v57 = vmul.f32 %v223_v56, %v190_v37 }
 0x13e   : > { %225 = vst [vmem:[%s120_s19] sm:$0xff] %v224_v57 }
 0x13f   : > { %447 = shalt.err (!%p444_p7)
}
 0x140   : > { %323 = dma.vmem_to_hbm [thread:$0]  (%p550_p5), %s240_s20, 128, %s242_s25, %s227_s3  }
 0x141 PF: > { %p335_p8 = scmp.ge.s32.totalorder %s488_s16, 2  ;;  %s253_s5 = sand.u32 1, %s476_s13  }
 0x142   : > { %s254_s6 = scalar_lea.sflag [#allocation7], %s253_s5 }
 0x143   : > { %p330_p9 = pnand %p335_p8, %p554_p6 }
 0x145   : > { %p331_p10 = pneg %p330_p9 }
 0x147   : > { %471 = dma.done.wait (%p331_p10), %s254_s6, 128  }
 0x148   : > { %473 = vsyncadd (%p331_p10), %s254_s6, 4294967168  ;;  %p21_p11 = scmp.ge.s32.totalorder %s537_s18, 4   ;;  %s627_s13 = smov %s480_s14 }
 0x149   : > { %s628_s14 = smov %s484_s15  ;;  %s629_s15 = smov %s548_s21 }
 0x14a   : > { %s630_s16 = smov %s537_s18  ;;  %23 = sbr.rel (!%p21_p11) target bundleno = 10 (0xa), region = 66 }
 0x14f   :  { %260 = vsyncpa [#allocation6], 1 }
 0x150   :  { %262 = vsyncpa [#allocation6 + $0x1], 1 }
 0x151   :  { %263 = vsyncpa [#allocation7], 1 }
 0x152   :  { %265 = vsyncpa [#allocation7 + $0x1], 1 }

</bundles_post_ra>
